<compile_context>
chip_gen: v5e
topology: v5e:2x2
jax: 0.10.0
libtpu: 0.0.40
codegen_flags: <defaults>
</compile_context>

<pallas_src>
import math
import numpy as np

import jax
import jax.numpy as jnp
from jax.experimental import pallas as pl
from jax.experimental.pallas import tpu as pltpu


# --------------------------------------------------------------------------
# Fused Pallas kernel: LSTM recurrence + attention + Linear head
# --------------------------------------------------------------------------

def _lstm_attention_kernel(x_ref, lens_ref, wih_ref, whh_ref, b_ref,
                           wfc_ref, bfc_ref, out_ref, out2_ref, hist_ref):
    """
    x_ref:    (T, B, Din)  time-major input (f32)
    lens_ref: (B, 1)       int32 sequence lengths
    wih_ref:  (Din, 4H)    input->gates weights (i, f, g, o order, PyTorch)
    whh_ref:  (H, 4H)      hidden->gates weights
    b_ref:    (1, 4H)      b_ih + b_hh folded
    wfc_ref:  (2H, C)      final Linear weight (transposed)
    bfc_ref:  (1, C)       final Linear bias
    out_ref:  (B, C)       logits        (torch `out` squeezed)
    out2_ref: (B, 2H)      [h1, context] (torch `out2` squeezed)
    hist_ref: (T, B, H)    VMEM scratch: padded LSTM outputs (zero past length)
    """
    T, B, _ = x_ref.shape
    H = whh_ref.shape[0]

    wih = wih_ref[...]
    whh = whh_ref[...]
    b = b_ref[...]
    lens = lens_ref[...]                       # (B, 1) int32

    def step(t, carry):
        h, c = carry
        gates = (jnp.dot(x_ref[t], wih, preferred_element_type=jnp.float32)
                 + jnp.dot(h, whh, preferred_element_type=jnp.float32)
                 + b)                          # (B, 4H) — lane-dense (4H = 128)
        i = jax.nn.sigmoid(gates[:, 0 * H:1 * H])
        f = jax.nn.sigmoid(gates[:, 1 * H:2 * H])
        g = jnp.tanh(gates[:, 2 * H:3 * H])
        o = jax.nn.sigmoid(gates[:, 3 * H:4 * H])
        c_new = f * c + i * g
        h_new = o * jnp.tanh(c_new)

        # packed-sequence semantics: only advance sequences with t < len[b]
        mask = t < lens                        # (B, 1) bool
        h = jnp.where(mask, h_new, h)
        c = jnp.where(mask, c_new, c)
        hist_ref[t] = jnp.where(mask, h_new, 0.0)   # zero-padded `outputs`
        return h, c

    h0 = jnp.zeros((B, H), jnp.float32)
    c0 = jnp.zeros((B, H), jnp.float32)
    h1, _ = jax.lax.fori_loop(0, T, step, (h0, c0))   # h1 == h_{len[b]-1}

    # ---- attention (softmax over the padded time axis, like the reference) --
    hist = hist_ref[...]                                       # (T, B, H)
    e = jnp.sum(hist * h1[None, :, :], axis=-1, keepdims=True)  # (T, B, 1)
    m = jnp.max(e, axis=0, keepdims=True)                       # (1, B, 1)
    p = jnp.exp(e - m)
    denom = jnp.sum(p, axis=0, keepdims=True)                   # (1, B, 1)
    scores = p / denom                                          # (T, B, 1)
    context = jnp.sum(scores * hist, axis=0)                    # (B, H)

    # ---- out2 = concat([h1, context], -1); out = out2 @ Wfc + bfc ----------
    out2_ref[:, 0:H] = h1.astype(out2_ref.dtype)
    out2_ref[:, H:2 * H] = context.astype(out2_ref.dtype)
    logits = (jnp.dot(h1, wfc_ref[0:H, :], preferred_element_type=jnp.float32)
              + jnp.dot(context, wfc_ref[H:2 * H, :],
                        preferred_element_type=jnp.float32)
              + bfc_ref[...])
    out_ref[...] = logits.astype(out_ref.dtype)


# --------------------------------------------------------------------------
# Wrapper
# --------------------------------------------------------------------------

def lstm_attention_forward(x, len_of_oneTr, params):
    """x: (B, T, input_size) batch-first (PyTorch convention);
    len_of_oneTr: (B,) int lengths (sorted descending, max == T).
    Returns (out, out2) with shapes (1, B, num_classes), (1, B, 2*hidden)."""
    B, T, _ = x.shape
    H = params["W_hh"].shape[0]
    C = params["W_fc"].shape[1]

    # Single boundary transpose to time-major so the serial recurrence indexes
    # the leading (untiled) axis inside the kernel.
    x_tbd = jnp.transpose(x, (1, 0, 2)).astype(jnp.float32)
    lens2 = len_of_oneTr.reshape(B, 1).astype(jnp.int32)

    vmem = pl.BlockSpec(memory_space=pltpu.MemorySpace.VMEM)
    out, out2 = pl.pallas_call(
        _lstm_attention_kernel,
        out_shape=(jax.ShapeDtypeStruct((B, C), jnp.float32),
                   jax.ShapeDtypeStruct((B, 2 * H), jnp.float32)),
        in_specs=[vmem] * 7,
        out_specs=(vmem, vmem),
        scratch_shapes=[pltpu.VMEM((T, B, H), jnp.float32)],
    )(x_tbd, lens2, params["W_ih"], params["W_hh"], params["b"],
      params["W_fc"], params["b_fc"])

    # Match the PyTorch shapes: (1, B, C) and (1, B, 2H).
    return out[None], out2[None]


# --------------------------------------------------------------------------
# Deterministic parameter construction + pure-JAX reference
# --------------------------------------------------------------------------

def make_params(key, input_size, hidden_size, num_classes):
    H = hidden_size
    ks = jax.random.split(key, 6)
    bound = 1.0 / math.sqrt(H)
    W_ih = jax.random.uniform(ks[0], (input_size, 4 * H), jnp.float32, -bound, bound)
    W_hh = jax.random.uniform(ks[1], (H, 4 * H), jnp.float32, -bound, bound)
    b_ih = jax.random.uniform(ks[2], (4 * H,), jnp.float32, -bound, bound)
    b_hh = jax.random.uniform(ks[3], (4 * H,), jnp.float32, -bound, bound)
    fb = 1.0 / math.sqrt(2 * H)
    W_fc = jax.random.uniform(ks[4], (2 * H, num_classes), jnp.float32, -fb, fb)
    b_fc = jax.random.uniform(ks[5], (1, num_classes), jnp.float32, -fb, fb)
    return dict(W_ih=W_ih, W_hh=W_hh, b=(b_ih + b_hh).reshape(1, 4 * H),
                W_fc=W_fc, b_fc=b_fc)


def ref_forward(x, lens, params):
    """Pure-JAX reference (same math as the PyTorch module)."""
    B, T, _ = x.shape
    W_ih, W_hh, b = params["W_ih"], params["W_hh"], params["b"]
    W_fc, b_fc = params["W_fc"], params["b_fc"]
    H = W_hh.shape[0]

    h = jnp.zeros((B, H), jnp.float32)
    c = jnp.zeros((B, H), jnp.float32)
    outs = []
    for t in range(T):
        gates = x[:, t, :] @ W_ih + h @ W_hh + b
        i = jax.nn.sigmoid(gates[:, 0 * H:1 * H])
        f = jax.nn.sigmoid(gates[:, 1 * H:2 * H])
        g = jnp.tanh(gates[:, 2 * H:3 * H])
        o = jax.nn.sigmoid(gates[:, 3 * H:4 * H])
        c_new = f * c + i * g
        h_new = o * jnp.tanh(c_new)
        mask = (t < lens)[:, None]
        h = jnp.where(mask, h_new, h)
        c = jnp.where(mask, c_new, c)
        outs.append(jnp.where(mask, h_new, 0.0))
    outputs = jnp.stack(outs, axis=1)                      # (B, T, H)
    h1 = h
    e = jnp.sum(h1[:, None, :] * outputs, axis=-1)         # (B, T)
    scores = jax.nn.softmax(e, axis=1)
    context = jnp.sum(scores[:, :, None] * outputs, axis=1)  # (B, H)
    out2 = jnp.concatenate([h1, context], axis=1)
    out = out2 @ W_fc + b_fc
    return out[None], out2[None]


# --------------------------------------------------------------------------
# Main
# --------------------------------------------------------------------------

if __name__ == "__main__":
    # Small, TPU-friendly sizes consistent with the module: hidden=32 makes the
    # gate GEMM output exactly 128 lanes wide.
    B, T = 4, 8
    input_size, hidden_size, num_classes = 8, 32, 4

    key = jax.random.PRNGKey(0)
    k_params, k_x = jax.random.split(key)
    params = make_params(k_params, input_size, hidden_size, num_classes)
    x = jax.random.normal(k_x, (B, T, input_size), jnp.float32)
    # sorted descending (pack_padded_sequence requirement), max length == T
    len_of_oneTr = jnp.array([8, 7, 5, 3], dtype=jnp.int32)

    out, out2 = lstm_attention_forward(x, len_of_oneTr, params)
    out, out2 = jax.block_until_ready((out, out2))

    ref_out, ref_out2 = ref_forward(x, len_of_oneTr, params)

    assert out.shape == (1, B, num_classes), out.shape
    assert out2.shape == (1, B, 2 * hidden_size), out2.shape
    for got, ref, name in ((out, ref_out, "out"), (out2, ref_out2, "out2")):
        got_np, ref_np = np.asarray(got), np.asarray(ref)
        if not np.allclose(got_np, ref_np, atol=2e-3, rtol=2e-3):
            raise AssertionError(
                f"{name} mismatch vs reference, max abs err = "
                f"{np.max(np.abs(got_np - ref_np))}")

    print("KERNEL_OK")
</pallas_src>

<mosaic_0001>
module attributes {stable_mosaic.version = 11 : i64} {
  func.func @_lstm_attention_kernel(%arg0: memref<8x4x8xf32, #tpu.memory_space<vmem>>, %arg1: memref<4x1xi32, #tpu.memory_space<vmem>>, %arg2: memref<8x128xf32, #tpu.memory_space<vmem>>, %arg3: memref<32x128xf32, #tpu.memory_space<vmem>>, %arg4: memref<1x128xf32, #tpu.memory_space<vmem>>, %arg5: memref<64x4xf32, #tpu.memory_space<vmem>>, %arg6: memref<1x4xf32, #tpu.memory_space<vmem>>, %arg7: memref<4x4xf32, #tpu.memory_space<vmem>>, %arg8: memref<4x64xf32, #tpu.memory_space<vmem>>, %arg9: memref<8x4x32xf32, #tpu.memory_space<vmem>>) attributes {dimension_semantics = [], scalar_prefetch = 0 : i64, scratch_operands = 1 : i64, tpu.core_type = #tpu.core_type<tc>} {
    %c0 = arith.constant 0 : index
    %c0_0 = arith.constant 0 : index
    %0 = vector.load %arg2[%c0, %c0_0] : memref<8x128xf32, #tpu.memory_space<vmem>>, vector<8x128xf32>
    %c0_1 = arith.constant 0 : index
    %c0_2 = arith.constant 0 : index
    %1 = vector.load %arg3[%c0_1, %c0_2] : memref<32x128xf32, #tpu.memory_space<vmem>>, vector<32x128xf32>
    %c0_3 = arith.constant 0 : index
    %c0_4 = arith.constant 0 : index
    %2 = vector.load %arg4[%c0_3, %c0_4] : memref<1x128xf32, #tpu.memory_space<vmem>>, vector<1x128xf32>
    %c0_5 = arith.constant 0 : index
    %c0_6 = arith.constant 0 : index
    %3 = vector.load %arg1[%c0_5, %c0_6] : memref<4x1xi32, #tpu.memory_space<vmem>>, vector<4x1xi32>
    %cst = arith.constant 0.000000e+00 : f32
    %4 = vector.broadcast %cst : f32 to vector<4x32xf32>
    %cst_7 = arith.constant 0.000000e+00 : f32
    %5 = vector.broadcast %cst_7 : f32 to vector<4x32xf32>
    %c0_i32 = arith.constant 0 : i32
    %c8_i32 = arith.constant 8 : i32
    %6 = arith.addi %c0_i32, %c8_i32 : i32
    %c1_i32 = arith.constant 1 : i32
    %7:2 = scf.for %arg10 = %c0_i32 to %6 step %c1_i32 iter_args(%arg11 = %4, %arg12 = %5) -> (vector<4x32xf32>, vector<4x32xf32>)  : i32 {
      %37 = arith.index_cast %arg10 : i32 to index
      %c0_29 = arith.constant 0 : index
      %c0_30 = arith.constant 0 : index
      %38 = vector.load %arg0[%37, %c0_29, %c0_30] : memref<8x4x8xf32, #tpu.memory_space<vmem>>, vector<1x4x8xf32>
      %39 = vector.shape_cast %38 : vector<1x4x8xf32> to vector<4x8xf32>
      %cst_31 = arith.constant dense<0.000000e+00> : vector<4x128xf32>
      %40 = tpu.matmul %39, %0, %cst_31 {dimension_numbers = #tpu.dot_dimension_numbers<[1], [0], [0], [1], [0, 0, 1, 1], [], []>} : vector<4x8xf32>, vector<8x128xf32>, vector<4x128xf32> -> vector<4x128xf32>
      %cst_32 = arith.constant dense<0.000000e+00> : vector<4x128xf32>
      %41 = tpu.matmul %arg11, %1, %cst_32 {dimension_numbers = #tpu.dot_dimension_numbers<[1], [0], [0], [1], [0, 0, 1, 1], [], []>} : vector<4x32xf32>, vector<32x128xf32>, vector<4x128xf32> -> vector<4x128xf32>
      %42 = arith.addf %40, %41 : vector<4x128xf32>
      %43 = vector.broadcast %2 : vector<1x128xf32> to vector<4x128xf32>
      %44 = arith.addf %42, %43 : vector<4x128xf32>
      %45 = vector.extract_strided_slice %44 {offsets = [0, 0], sizes = [4, 32], strides = [1, 1]} : vector<4x128xf32> to vector<4x32xf32>
      %46 = arith.negf %45 : vector<4x32xf32>
      %47 = math.exp %46 : vector<4x32xf32>
      %cst_33 = arith.constant 1.000000e+00 : f32
      %48 = vector.broadcast %cst_33 : f32 to vector<4x32xf32>
      %49 = arith.addf %48, %47 : vector<4x32xf32>
      %50 = arith.divf %48, %49 : vector<4x32xf32>
      %51 = vector.extract_strided_slice %44 {offsets = [0, 32], sizes = [4, 32], strides = [1, 1]} : vector<4x128xf32> to vector<4x32xf32>
      %52 = arith.negf %51 : vector<4x32xf32>
      %53 = math.exp %52 : vector<4x32xf32>
      %cst_34 = arith.constant 1.000000e+00 : f32
      %54 = vector.broadcast %cst_34 : f32 to vector<4x32xf32>
      %55 = arith.addf %54, %53 : vector<4x32xf32>
      %56 = arith.divf %54, %55 : vector<4x32xf32>
      %57 = vector.extract_strided_slice %44 {offsets = [0, 64], sizes = [4, 32], strides = [1, 1]} : vector<4x128xf32> to vector<4x32xf32>
      %58 = math.tanh %57 : vector<4x32xf32>
      %59 = vector.extract_strided_slice %44 {offsets = [0, 96], sizes = [4, 32], strides = [1, 1]} : vector<4x128xf32> to vector<4x32xf32>
      %60 = arith.negf %59 : vector<4x32xf32>
      %61 = math.exp %60 : vector<4x32xf32>
      %cst_35 = arith.constant 1.000000e+00 : f32
      %62 = vector.broadcast %cst_35 : f32 to vector<4x32xf32>
      %63 = arith.addf %62, %61 : vector<4x32xf32>
      %64 = arith.divf %62, %63 : vector<4x32xf32>
      %65 = arith.mulf %56, %arg12 : vector<4x32xf32>
      %66 = arith.mulf %50, %58 : vector<4x32xf32>
      %67 = arith.addf %65, %66 : vector<4x32xf32>
      %68 = math.tanh %67 : vector<4x32xf32>
      %69 = arith.mulf %64, %68 : vector<4x32xf32>
      %70 = vector.broadcast %arg10 : i32 to vector<4x1xi32>
      %71 = arith.cmpi slt, %70, %3 : vector<4x1xi32>
      %72 = vector.shape_cast %71 : vector<4x1xi1> to vector<4x1xi1>
      %73 = vector.broadcast %72 : vector<4x1xi1> to vector<4x32xi1>
      %74 = arith.select %73, %69, %arg11 : vector<4x32xi1>, vector<4x32xf32>
      %75 = vector.shape_cast %71 : vector<4x1xi1> to vector<4x1xi1>
      %76 = vector.broadcast %75 : vector<4x1xi1> to vector<4x32xi1>
      %77 = arith.select %76, %67, %arg12 : vector<4x32xi1>, vector<4x32xf32>
      %cst_36 = arith.constant 0.000000e+00 : f32
      %78 = vector.shape_cast %71 : vector<4x1xi1> to vector<4x1xi1>
      %79 = vector.broadcast %78 : vector<4x1xi1> to vector<4x32xi1>
      %80 = vector.broadcast %cst_36 : f32 to vector<4x32xf32>
      %81 = arith.select %79, %69, %80 : vector<4x32xi1>, vector<4x32xf32>
      %82 = arith.index_cast %arg10 : i32 to index
      %c0_37 = arith.constant 0 : index
      %c0_38 = arith.constant 0 : index
      %83 = vector.load %arg9[%82, %c0_37, %c0_38] : memref<8x4x32xf32, #tpu.memory_space<vmem>>, vector<1x4x32xf32>
      %84 = vector.shape_cast %83 : vector<1x4x32xf32> to vector<4x32xf32>
      %85 = vector.shape_cast %81 : vector<4x32xf32> to vector<1x4x32xf32>
      tpu.vector_store %arg9[%82, %c0_37, %c0_38], %85 {strides = array<i32>} : memref<8x4x32xf32, #tpu.memory_space<vmem>>, vector<1x4x32xf32>,
      scf.yield %74, %77 : vector<4x32xf32>, vector<4x32xf32>
    }
    %c8_i32_8 = arith.constant 8 : i32
    %c0_9 = arith.constant 0 : index
    %c0_10 = arith.constant 0 : index
    %c0_11 = arith.constant 0 : index
    %8 = vector.load %arg9[%c0_9, %c0_10, %c0_11] : memref<8x4x32xf32, #tpu.memory_space<vmem>>, vector<8x4x32xf32>
    %9 = vector.shape_cast %7#0 : vector<4x32xf32> to vector<1x4x32xf32>
    %10 = vector.broadcast %9 : vector<1x4x32xf32> to vector<8x4x32xf32>
    %11 = arith.mulf %8, %10 : vector<8x4x32xf32>
    %cst_12 = arith.constant dense<0.000000e+00> : vector<8x4xf32>
    %12 = vector.multi_reduction <add>, %11, %cst_12 [2] : vector<8x4x32xf32> to vector<8x4xf32>
    %13 = vector.shape_cast %12 : vector<8x4xf32> to vector<8x4x1xf32>
    %cst_13 = arith.constant dense<0xFF800000> : vector<4x1xf32>
    %14 = vector.multi_reduction <maximumf>, %13, %cst_13 [0] : vector<8x4x1xf32> to vector<4x1xf32>
    %15 = vector.shape_cast %14 : vector<4x1xf32> to vector<1x4x1xf32>
    %16 = vector.broadcast %15 : vector<1x4x1xf32> to vector<8x4x1xf32>
    %17 = arith.subf %13, %16 : vector<8x4x1xf32>
    %18 = math.exp %17 : vector<8x4x1xf32>
    %cst_14 = arith.constant dense<0.000000e+00> : vector<4x1xf32>
    %19 = vector.multi_reduction <add>, %18, %cst_14 [0] : vector<8x4x1xf32> to vector<4x1xf32>
    %20 = vector.shape_cast %19 : vector<4x1xf32> to vector<1x4x1xf32>
    %21 = vector.broadcast %20 : vector<1x4x1xf32> to vector<8x4x1xf32>
    %22 = arith.divf %18, %21 : vector<8x4x1xf32>
    %23 = vector.broadcast %22 : vector<8x4x1xf32> to vector<8x4x32xf32>
    %24 = arith.mulf %23, %8 : vector<8x4x32xf32>
    %cst_15 = arith.constant dense<0.000000e+00> : vector<4x32xf32>
    %25 = vector.multi_reduction <add>, %24, %cst_15 [0] : vector<8x4x32xf32> to vector<4x32xf32>
    %c0_16 = arith.constant 0 : index
    %c0_17 = arith.constant 0 : index
    %26 = vector.load %arg8[%c0_16, %c0_17] : memref<4x64xf32, #tpu.memory_space<vmem>>, vector<4x32xf32>
    tpu.vector_store %arg8[%c0_16, %c0_17], %7#0 {strides = array<i32>} : memref<4x64xf32, #tpu.memory_space<vmem>>, vector<4x32xf32>,
    %c0_18 = arith.constant 0 : index
    %c32 = arith.constant 32 : index
    %27 = vector.load %arg8[%c0_18, %c32] : memref<4x64xf32, #tpu.memory_space<vmem>>, vector<4x32xf32>
    tpu.vector_store %arg8[%c0_18, %c32], %25 {strides = array<i32>} : memref<4x64xf32, #tpu.memory_space<vmem>>, vector<4x32xf32>,
    %c0_19 = arith.constant 0 : index
    %c0_20 = arith.constant 0 : index
    %28 = vector.load %arg5[%c0_19, %c0_20] : memref<64x4xf32, #tpu.memory_space<vmem>>, vector<32x4xf32>
    %cst_21 = arith.constant dense<0.000000e+00> : vector<4x4xf32>
    %29 = tpu.matmul %7#0, %28, %cst_21 {dimension_numbers = #tpu.dot_dimension_numbers<[1], [0], [0], [1], [0, 0, 1, 1], [], []>} : vector<4x32xf32>, vector<32x4xf32>, vector<4x4xf32> -> vector<4x4xf32>
    %c32_22 = arith.constant 32 : index
    %c0_23 = arith.constant 0 : index
    %30 = vector.load %arg5[%c32_22, %c0_23] : memref<64x4xf32, #tpu.memory_space<vmem>>, vector<32x4xf32>
    %cst_24 = arith.constant dense<0.000000e+00> : vector<4x4xf32>
    %31 = tpu.matmul %25, %30, %cst_24 {dimension_numbers = #tpu.dot_dimension_numbers<[1], [0], [0], [1], [0, 0, 1, 1], [], []>} : vector<4x32xf32>, vector<32x4xf32>, vector<4x4xf32> -> vector<4x4xf32>
    %32 = arith.addf %29, %31 : vector<4x4xf32>
    %c0_25 = arith.constant 0 : index
    %c0_26 = arith.constant 0 : index
    %33 = vector.load %arg6[%c0_25, %c0_26] : memref<1x4xf32, #tpu.memory_space<vmem>>, vector<1x4xf32>
    %34 = vector.broadcast %33 : vector<1x4xf32> to vector<4x4xf32>
    %35 = arith.addf %32, %34 : vector<4x4xf32>
    %c0_27 = arith.constant 0 : index
    %c0_28 = arith.constant 0 : index
    %36 = vector.load %arg7[%c0_27, %c0_28] : memref<4x4xf32, #tpu.memory_space<vmem>>, vector<4x4xf32>
    tpu.vector_store %arg7[%c0_27, %c0_28], %35 {strides = array<i32>} : memref<4x4xf32, #tpu.memory_space<vmem>>, vector<4x4xf32>,
    return
  }
}

</mosaic_0001>

<bundles_post_ra>
// kernel: tpu_custom_call.1
= control target key start
LH: loop header
LB: loop body
LE: loop exit
PB: predicated region body
PF: predicated region fallthrough
CT: control target
= control target key end

     0   :  { %14 = vsyncpa [#allocation4], 0  ;;  %s836_s0 = inlined_call_operand.vmem [shape: f32[8,4,8], index: 0, kind: input, shape index: {}]   ;;  %s837_s1 = inlined_call_operand.vmem [shape: s32[4,1], index: 1, kind: input, shape index: {}]   ;;  %s838_s2 = inlined_call_operand.hbm [shape: f32[8,128], index: 2, kind: input, shape index: {}]   ;;  %s839_s3 = inlined_call_operand.vmem [shape: f32[32,128], index: 3, kind: input, shape index: {}]   ;;  %s840_s4 = inlined_call_operand.vmem [shape: f32[1,128], index: 4, kind: input, shape index: {}]   ;;  %s841_s5 = inlined_call_operand.vmem [shape: f32[64,4], index: 5, kind: input, shape index: {}]   ;;  %s842_s6 = inlined_call_operand.vmem [shape: f32[1,4], index: 6, kind: input, shape index: {}]   ;;  %s843_s7 = inlined_call_operand.hbm [shape: f32[4,4], index: 7, kind: output, shape index: {0}]   ;;  %s844_s8 = inlined_call_operand.hbm [shape: f32[4,64], index: 8, kind: output, shape index: {1}]  }
   0x1   :  { %15 = vsyncpa [#allocation5], 0 }
   0x2   :  { %16 = vsyncpa [#allocation8], 0  ;;  %s26_s29 = sshll.u32 %s838_s2, 4  ;;  %s598_s30 = smov [#allocation3]   ;;  %s27_s29 = int_to_ptr.hbm [resolvable:$true] %s26_s29 }
   0x3   :  { %s28_s9 = sshll.u32 %s598_s30, 4  ;;  %s29_s9 = int_to_ptr.vmem [resolvable:$true] %s28_s9 }
   0x4   :  { %31 = dma.hbm_to_vmem [thread:$0]  %s27_s29, 128, %s29_s9, [#allocation4]  }
   0x5   :  { %580 = dma.done.wait [#allocation4], 128  }
   0x6   :  { %581 = vsyncadd [#allocation4], 4294967168  ;;  %v653_v0 = vld [vmem:[#allocation3] sm:$0xff]  ;;  %v663_v2 = vld [vmem:[%s839_s3 + $0x8] sm:$0xff]  ;;  %v685_v7 = vmov 0.0   ;;  %v687_v8 = vmov 0.0  }
   0x7   :  { %v658_v1 = vld [vmem:[%s839_s3] sm:$0xff]  ;;  %v668_v3 = vld [vmem:[%s839_s3 + $0x10] sm:$0xff]  ;;  %v673_v4 = vld [vmem:[%s839_s3 + $0x18] sm:$0xff]  ;;  %s689_s21 = smov 0  }
   0x8   :  { %v678_v5 = vld [vmem:[%s840_s4] sm:$0x1] }
   0x9   :  { %v683_v6 = vld [vmem:[%s837_s1] sm:$0xf] }
   0xa LB: > { %80 = vmatpush.msra.mxu0 %v673_v4  ;;  %107 = vmatpush.msra.mxu1 %v653_v0  ;;  %s599_s1 = smov 32   ;;  %s430_s3 = sshll.u32 %s596_s21, 2  ;;  %vm88_vm0 = vcmask 64512   ;;  %vm65_vm1 = vcmask 261120   ;;  %v113_v12 = vperm.slane %v678_v5, 0  ;;  %v153_v20 = vstv %s596_s21  ;;  %s596_s21 = sphi %s689_s21, %s56_s21   ;;  %v592_v8 = vphi %v687_v8, %v845_v8   ;;  %v588_v7 = vphi %v685_v7, %v161_v7  }
   0xb   : > { %63 = vrot.lane.b32.xlu0 %v592_v8, %s599_s1  ;;  %s60_s23 = scalar_lea.vmem %s836_s0, %s430_s3  ;;  %s600_s24 = smov 64   ;;  %v601_v21 = vmov 0   ;;  %vm154_vm2 = vcmp.lt.s32.totalorder %v153_v20, %v683_v6  ;;  %vm168_vm8 = vcmask 257024  }
   0xc   : > { %81 = vmatpush.msra.mxu0 %v668_v3  ;;  %v61_v9 = vld [vmem:[%s60_s23] sm:$0xf]  ;;  %467 = vset.pattern.permute.xlu2 %v601_v21  ;;  %v155_v22 = vsel %vm154_vm2, 1, %v601_v21  ;;  %s167_s25 = scalar_lea.vmem [#allocation2], %s430_s3  ;;  %s56_s21 = sadd.s32 1, %s596_s21  }
   0xd   : > { %432 = vmatmul.msk.f32.vlgmr.msra.gmra.mxu1 %vm88_vm0, %v61_v9  ;;  %468 = vset.pattern.permute.xlu0 %v601_v21  ;;  %p53_p0 = scmp.ge.s32.totalorder %s56_s21, 8  }
   0xe   : > { %82 = vmatpush.msra.mxu0 %v663_v2  ;;  %157 = vperm.xlu2 %467, %v155_v22   ;;  %v325_v45 = vld [vmem:[%s841_s5 + $0x18] sm:$0xff] (%p53_p0)  ;;  %v324_v46 = vld [vmem:[%s841_s5 + $0x10] sm:$0xff] (%p53_p0)  ;;  %s602_s30 = smov (%p53_p0), 32   ;;  %v323_v47 = vld [vmem:[%s841_s5 + $0x8] sm:$0xff] (%p53_p0)  ;;  %vm215_vm9 = vcmask (%p53_p0), 1043456   ;;  %vm320_vm14 = vcmask (%p53_p0), 519424  }
   0xf   :  { %367 = vmatpush.msra.mxu1 (%p53_p0), %v325_v45  ;;  %v322_v48 = vld [vmem:[%s841_s5] sm:$0xff] (%p53_p0)  ;;  %s604_s22 = smov (%p53_p0), [#allocation6]   ;;  %s389_s26 = sshll.u32 (%p53_p0), %s843_s7, 4  ;;  %vm380_vm15 = vcmask (%p53_p0), 27648   ;;  %s390_s26 = int_to_ptr.hbm [resolvable:$true] %s389_s26 }
  0x10   : > { %83 = vmatpush.msra.mxu0 %v658_v1  ;;  %s387_s23 = sshll.u32 (%p53_p0), %s604_s22, 4  ;;  %s388_s23 = int_to_ptr.vmem [resolvable:$true] %s387_s23 }
  0x11   :  { %368 = vmatpush.msra.mxu1 (%p53_p0), %v324_v46 }
  0x13   :  { %369 = vmatpush.msra.mxu1 (%p53_p0), %v323_v47 }
  0x15   :  { %370 = vmatpush.msra.mxu1 (%p53_p0), %v322_v48 }
  0x68   : > { %v158_v35 = vpop.permute.xlu2 %157 }
  0x69   : > { %vm159_vm7 = vcmp.eq.s32.totalorder %v158_v35, 1 }
  0x7d   : > { %v64_v10 = vpop.permute.xlu0 %63 }
  0x7e   : > { %431 = vmatmul.msk.f32.vlgmr.msra.gmra.mxu0 %vm65_vm1, %v64_v10 }
  0x8a   : > { %v109_v11 = vpop.f32.mrf.mxu1 }
  0xfb   : > { %v85_v13 = vpop.f32.mrf.mxu0 }
  0xfc   : > { %v110_v14 = vadd.f32 %v109_v11, %v85_v13 }
  0xfe   : > { %v115_v15 = vadd.f32 %v113_v12, %v110_v14 }
 0x100   : > { %469 = vtanh.f32 %v115_v15  ;;  %v433_v17 = vmul.f32 -1.442695, %v115_v15 }
 0x102   : > { %471 = vpow2.f32 %v433_v17 }
 0x106   : > { %v470_v16 = vpop.eup %469 }
 0x107   : > { %138 = vrot.lane.b32.xlu0 %v470_v16, %s600_s24 }
 0x108   : > { %v472_v18 = vpop.eup %471 }
 0x109   : > { %v119_v19 = vadd.f32 1.0, %v472_v18 }
 0x10b   : > { %473 = vrcp.f32 %v119_v19  ;;  %v131_v28 = vand.u32 2147483648, %v119_v19  ;;  %vm125_vm4 = vweird.f32 %v119_v19  ;;  %v129_v29 = vand.u32 2147483647, %v119_v19 }
 0x10d   : > { %v132_v31 = vor.u32 1.1754944e-38, %v131_v28  ;;  %vm130_vm6 = vcmp.eq.f32.partialorder %v129_v29, 8.507059e+37 }
 0x111   : > { %v474_v23 = vpop.eup %473 }
 0x112   : > { %v121_v24 = vmul.f32 %v474_v23, %v119_v19  ;;  %vm126_vm3 = vweird.f32 %v474_v23 }
 0x113   : > { %vm127_vm5 = vmor %vm125_vm4, %vm126_vm3 }
 0x114   : > { %v122_v25 = vsub.f32 1.0, %v121_v24 }
 0x116   : > { %v123_v26 = vmul.f32 %v474_v23, %v122_v25 }
 0x118   : > { %v124_v27 = vadd.f32 %v474_v23, %v123_v26 }
 0x11a   : > { %v128_v30 = vsel %vm127_vm5, %v474_v23, %v124_v27 }
 0x11b   : > { %v133_v33 = vsel %vm130_vm6, %v132_v31, %v128_v30 }
 0x11c   : > { %v136_v36 = vmul.f32 %v588_v7, %v133_v33 }
 0x179   : > { %v139_v32 = vpop.permute.xlu0 %138 }
 0x17a   : > { %v141_v34 = vmul.f32 %v139_v32, %v133_v33 }
 0x17c   : > { %143 = vrot.lane.b32.xlu1 %v141_v34, %s599_s1 }
 0x1ee   : > { %v144_v37 = vpop.permute.xlu1 %143 }
 0x1ef   : > { %v146_v38 = vadd.f32 %v144_v37, %v136_v36 }
 0x1f1   : > { %475 = vtanh.f32 %v146_v38  ;;  %v161_v7 = vsel %vm159_vm7, %v146_v38, %v588_v7  }
 0x1f7   : > { %v476_v39 = vpop.eup %475 }
 0x1f8   : > { %149 = vrot.lane.b32.xlu1 %v476_v39, %s600_s24 }
 0x26a   : > { %v150_v40 = vpop.permute.xlu1 %149 }
 0x26b   : > { %v152_v41 = vmul.f32 %v150_v40, %v133_v33 }
 0x26d   : > { %v160_v42 = vsel %vm159_vm7, %v152_v41, %v592_v8   ;;  %v162_v43 = vsel %vm159_vm7, %v152_v41, 0.0 }
 0x26e   : > { %164 = vrot.lane.b32.xlu2 %v162_v43, %s599_s1  ;;  %v845_v8 = vmov %v160_v42  ;;  %179 = vrot.lane.b32.xlu0 (%p53_p0), %v160_v42, %s602_s30  ;;  %s400_s1 = sshll.u32 (%p53_p0), %s844_s8, 4  ;;  %s401_s1 = int_to_ptr.hbm [resolvable:$true] %s400_s1 }
 0x2c5   :  { %55 = sbr.rel (!%p53_p0) target bundleno = 10 (0xa), region = 69 }
 0x2c8   : > { %v165_v44 = vpop.permute.xlu2 %164 }
 0x2c9   : > { %169 = vst.msk [vmem:[%s167_s25] sm:$0xf] %vm168_vm8, %v165_v44 }
 0x2d0   :  { %v747_v49 = vld [vmem:[#allocation2 + $0xc] sm:$0xf]  ;;  %v749_v50 = vld [vmem:[#allocation2 + $0x4] sm:$0xf]  ;;  %v751_v51 = vld [vmem:[#allocation2] sm:$0xf] }
 0x2d1   :  { %v761_v59 = vld [vmem:[#allocation2 + $0x10] sm:$0xf]  ;;  %v763_v60 = vld [vmem:[#allocation2 + $0x8] sm:$0xf]  ;;  %v769_v1 = vld [vmem:[#allocation2 + $0x18] sm:$0xf] }
 0x2d2   :  { %v771_v2 = vld [vmem:[#allocation2 + $0x14] sm:$0xf]  ;;  %v777_v7 = vld [vmem:[#allocation2 + $0x1c] sm:$0xf] }
 0x2e0   :  { %v180_v52 = vpop.permute.xlu0 %179 }
 0x2e1   :  { %315 = vst.msk [vmem:[#allocation7] sm:$0xf] %vm168_vm8, %v180_v52  ;;  %435 = vmatmul.msk.f32.vlgmr.msra.gmra.mxu1 %vm65_vm1, %v180_v52  ;;  %v185_v53 = vmul.f32 %v180_v52, %v747_v49  ;;  %v183_v54 = vmul.f32 %v180_v52, %v749_v50  ;;  %v182_v55 = vmul.f32 %v180_v52, %v751_v51 }
 0x2e2   :  { %v186_v61 = vmul.f32 %v180_v52, %v761_v59  ;;  %v184_v62 = vmul.f32 %v180_v52, %v763_v60  ;;  %v188_v3 = vmul.f32 %v180_v52, %v769_v1  ;;  %v187_v4 = vmul.f32 %v180_v52, %v771_v2 }
 0x2e3   :  { %v200_v56 = vsel %vm168_vm8, %v185_v53, 0.0  ;;  %v194_v57 = vsel %vm168_vm8, %v183_v54, 0.0  ;;  %v191_v58 = vsel %vm168_vm8, %v182_v55, 0.0  ;;  %v189_v8 = vmul.f32 %v180_v52, %v777_v7  ;;  %v329_v52 = vld [vmem:[%s841_s5 + $0x38] sm:$0xff]  ;;  %v328_v53 = vld [vmem:[%s841_s5 + $0x30] sm:$0xff] }
 0x2e4   :  { %201 = vadd.xlane.f32.xlu2 %v200_v56  ;;  %195 = vadd.xlane.f32.xlu1 %v194_v57  ;;  %v203_v63 = vsel %vm168_vm8, %v186_v61, 0.0  ;;  %v197_v0 = vsel %vm168_vm8, %v184_v62, 0.0  ;;  %v209_v5 = vsel %vm168_vm8, %v188_v3, 0.0  ;;  %v206_v6 = vsel %vm168_vm8, %v187_v4, 0.0  ;;  %v327_v61 = vld [vmem:[%s841_s5 + $0x28] sm:$0xff]  ;;  %v326_v3 = vld [vmem:[%s841_s5 + $0x20] sm:$0xff] }
 0x2e5   :  { %192 = vadd.xlane.f32.xlu0 %v191_v58  ;;  %v212_v9 = vsel %vm168_vm8, %v189_v8, 0.0  ;;  %345 = vmatpush.msra.mxu0 %v329_v52  ;;  %s603_s5 = smov [#allocation7]  }
 0x2e6   :  { %s398_s19 = sshll.u32 %s603_s5, 4  ;;  %s399_s19 = int_to_ptr.vmem [resolvable:$true] %s398_s19 }
 0x2e7   :  { %346 = vmatpush.msra.mxu0 %v328_v53 }
 0x2e9   :  { %347 = vmatpush.msra.mxu0 %v327_v61 }
 0x2eb   :  { %348 = vmatpush.msra.mxu0 %v326_v3 }
 0x2ec   :  { %204 = vadd.xlane.f32.xlu2 %v203_v63  ;;  %198 = vadd.xlane.f32.xlu1 %v197_v0 }
 0x2f4   :  { %210 = vadd.xlane.f32.xlu2 %v209_v5  ;;  %207 = vadd.xlane.f32.xlu1 %v206_v6 }
 0x2fc   :  { %213 = vadd.xlane.f32.xlu1 %v212_v9 }
 0x357   :  { %v202_v10 = vpop.xlane.xlu2 %201  ;;  %v196_v11 = vpop.xlane.xlu1 %195 }
 0x358   :  { %v193_v17 = vpop.xlane.xlu0 %192  ;;  %v217_v18 = vsel %vm215_vm9, %v196_v11, -inf  ;;  %v219_v23 = vsel %vm215_vm9, %v202_v10, -inf }
 0x359   :  { %v216_v24 = vsel %vm215_vm9, %v193_v17, -inf }
 0x35f   :  { %v199_v12 = vpop.xlane.xlu1 %198  ;;  %v205_v13 = vpop.xlane.xlu2 %204 }
 0x360   :  { %v220_v19 = vsel %vm215_vm9, %v205_v13, -inf  ;;  %v218_v25 = vsel %vm215_vm9, %v199_v12, -inf }
 0x361   :  { %v221_v27 = vmax.f32 %v216_v24, %v220_v19 }
 0x367   :  { %v208_v14 = vpop.xlane.xlu1 %207  ;;  %v211_v15 = vpop.xlane.xlu2 %210 }
 0x368   :  { %v222_v16 = vsel %vm215_vm9, %v208_v14, -inf  ;;  %v224_v20 = vsel %vm215_vm9, %v211_v15, -inf }
 0x369   :  { %v223_v21 = vmax.f32 %v217_v18, %v222_v16  ;;  %v225_v28 = vmax.f32 %v218_v25, %v224_v20 }
 0x36b   :  { %v228_v30 = vmax.f32 %v221_v27, %v223_v21 }
 0x36f   :  { %v214_v22 = vpop.xlane.xlu1 %213 }
 0x370   :  { %v226_v26 = vsel %vm215_vm9, %v214_v22, -inf }
 0x371   :  { %v227_v29 = vmax.f32 %v219_v23, %v226_v26 }
 0x373   :  { %v229_v31 = vmax.f32 %v225_v28, %v227_v29 }
 0x375   :  { %v230_v32 = vmax.f32 %v228_v30, %v229_v31 }
 0x377   :  { %v231_v33 = vsub.f32 %v193_v17, %v230_v32  ;;  %v232_v34 = vsub.f32 %v196_v11, %v230_v32  ;;  %v233_v35 = vsub.f32 %v199_v12, %v230_v32  ;;  %v234_v36 = vsub.f32 %v202_v10, %v230_v32 }
 0x378   :  { %v235_v37 = vsub.f32 %v205_v13, %v230_v32  ;;  %v236_v41 = vsub.f32 %v208_v14, %v230_v32  ;;  %v237_v43 = vsub.f32 %v211_v15, %v230_v32  ;;  %v238_v45 = vsub.f32 %v214_v22, %v230_v32 }
 0x379   :  { %v239_v38 = vmul.f32 1.442695, %v231_v33  ;;  %v241_v39 = vmul.f32 1.442695, %v232_v34  ;;  %v243_v40 = vmul.f32 1.442695, %v233_v35 }
 0x37a   :  { %v245_v42 = vmul.f32 1.442695, %v234_v36  ;;  %v247_v44 = vmul.f32 1.442695, %v235_v37  ;;  %v249_v46 = vmul.f32 1.442695, %v236_v41 }
 0x37b   :  { %478 = vpow2.f32 %v239_v38  ;;  %v251_v47 = vmul.f32 1.442695, %v237_v43  ;;  %v253_v55 = vmul.f32 1.442695, %v238_v45 }
 0x37c   :  { %480 = vpow2.f32 %v241_v39 }
 0x37d   :  { %482 = vpow2.f32 %v243_v40 }
 0x37e   :  { %484 = vpow2.f32 %v245_v42 }
 0x37f   :  { %486 = vpow2.f32 %v247_v44 }
 0x380   :  { %488 = vpow2.f32 %v249_v46 }
 0x381   :  { %v479_v48 = vpop.eup %478  ;;  %490 = vpow2.f32 %v251_v47 }
 0x382   :  { %v481_v54 = vpop.eup %480  ;;  %v255_v56 = vsel %vm215_vm9, %v479_v48, 0.0  ;;  %492 = vpow2.f32 %v253_v55 }
 0x383   :  { %v483_v57 = vpop.eup %482  ;;  %v256_v58 = vsel %vm215_vm9, %v481_v54, 0.0 }
 0x384   :  { %v485_v62 = vpop.eup %484  ;;  %v257_v63 = vadd.f32 %v256_v58, %v255_v56  ;;  %v258_v0 = vsel %vm215_vm9, %v483_v57, 0.0 }
 0x385   :  { %v487_v4 = vpop.eup %486  ;;  %v260_v6 = vsel %vm215_vm9, %v485_v62, 0.0 }
 0x386   :  { %v259_v5 = vadd.f32 %v258_v0, %v257_v63  ;;  %v489_v8 = vpop.eup %488  ;;  %v262_v10 = vsel %vm215_vm9, %v487_v4, 0.0 }
 0x387   :  { %v491_v11 = vpop.eup %490  ;;  %v264_v13 = vsel %vm215_vm9, %v489_v8, 0.0 }
 0x388   :  { %v261_v9 = vadd.f32 %v260_v6, %v259_v5  ;;  %v493_v14 = vpop.eup %492  ;;  %v266_v16 = vsel %vm215_vm9, %v491_v11, 0.0 }
 0x389   :  { %v268_v18 = vsel %vm215_vm9, %v493_v14, 0.0 }
 0x38a   :  { %v263_v12 = vadd.f32 %v262_v10, %v261_v9 }
 0x38c   :  { %v265_v15 = vadd.f32 %v264_v13, %v263_v12 }
 0x38e   :  { %v267_v17 = vadd.f32 %v266_v16, %v265_v15 }
 0x390   :  { %v269_v19 = vadd.f32 %v268_v18, %v267_v17 }
 0x392   :  { %494 = vrcp.f32 %v269_v19  ;;  %v281_v23 = vand.u32 2147483648, %v269_v19  ;;  %v279_v25 = vand.u32 2147483647, %v269_v19  ;;  %vm275_vm11 = vweird.f32 %v269_v19 }
 0x394   :  { %v282_v27 = vor.u32 1.1754944e-38, %v281_v23  ;;  %vm280_vm13 = vcmp.eq.f32.partialorder %v279_v25, 8.507059e+37 }
 0x398   :  { %v495_v20 = vpop.eup %494 }
 0x399   :  { %v271_v21 = vmul.f32 %v495_v20, %v269_v19  ;;  %vm276_vm10 = vweird.f32 %v495_v20 }
 0x39a   :  { %vm277_vm12 = vmor %vm275_vm11, %vm276_vm10 }
 0x39b   :  { %v272_v22 = vsub.f32 1.0, %v271_v21 }
 0x39d   :  { %v273_v24 = vmul.f32 %v495_v20, %v272_v22 }
 0x39f   :  { %v274_v26 = vadd.f32 %v495_v20, %v273_v24 }
 0x3a1   :  { %v278_v28 = vsel %vm277_vm12, %v495_v20, %v274_v26 }
 0x3a2   :  { %v283_v29 = vsel %vm280_vm13, %v282_v27, %v278_v28 }
 0x3a3   :  { %v284_v30 = vmul.f32 %v479_v48, %v283_v29  ;;  %v285_v31 = vmul.f32 %v481_v54, %v283_v29  ;;  %v286_v32 = vmul.f32 %v483_v57, %v283_v29  ;;  %v287_v33 = vmul.f32 %v485_v62, %v283_v29 }
 0x3a4   :  { %v288_v34 = vmul.f32 %v487_v4, %v283_v29  ;;  %v289_v38 = vmul.f32 %v489_v8, %v283_v29  ;;  %v290_v43 = vmul.f32 %v491_v11, %v283_v29  ;;  %v291_v47 = vmul.f32 %v493_v14, %v283_v29 }
 0x3a5   :  { %v292_v35 = vmul.f32 %v284_v30, %v751_v51  ;;  %v293_v36 = vmul.f32 %v285_v31, %v749_v50  ;;  %v294_v37 = vmul.f32 %v286_v32, %v763_v60  ;;  %v295_v39 = vmul.f32 %v287_v33, %v747_v49 }
 0x3a6   :  { %v296_v44 = vmul.f32 %v288_v34, %v761_v59  ;;  %v297_v51 = vmul.f32 %v289_v38, %v771_v2  ;;  %v298_v48 = vmul.f32 %v290_v43, %v769_v1  ;;  %v299_v53 = vmul.f32 %v291_v47, %v777_v7  ;;  %v477_v2 = vld [vmem:[%s842_s6] ss:$0 sm:$0xff]  ;;  %v372_v7 = vpop.f32.mrf.mxu1 }
 0x3a7   :  { %v300_v40 = vsel %vm168_vm8, %v292_v35, 0.0  ;;  %v301_v41 = vsel %vm168_vm8, %v293_v36, 0.0  ;;  %v303_v45 = vsel %vm168_vm8, %v294_v37, 0.0  ;;  %v305_v50 = vsel %vm168_vm8, %v295_v39, 0.0 }
 0x3a8   :  { %v302_v42 = vadd.f32 %v301_v41, %v300_v40  ;;  %v307_v49 = vsel %vm168_vm8, %v296_v44, 0.0  ;;  %v309_v54 = vsel %vm168_vm8, %v297_v51, 0.0  ;;  %v311_v59 = vsel %vm168_vm8, %v298_v48, 0.0 }
 0x3a9   :  { %v313_v57 = vsel %vm168_vm8, %v299_v53, 0.0 }
 0x3aa   :  { %v304_v46 = vadd.f32 %v303_v45, %v302_v42 }
 0x3ac   :  { %v306_v60 = vadd.f32 %v305_v50, %v304_v46 }
 0x3ae   :  { %v308_v52 = vadd.f32 %v307_v49, %v306_v60 }
 0x3b0   :  { %v310_v55 = vadd.f32 %v309_v54, %v308_v52 }
 0x3b2   :  { %v312_v56 = vadd.f32 %v311_v59, %v310_v55 }
 0x3b4   :  { %v314_v58 = vadd.f32 %v313_v57, %v312_v56 }
 0x3b6   :  { %317 = vrot.lane.b32.xlu2 %v314_v58, %s602_s30  ;;  %434 = vmatmul.msk.f32.vlgmr.msra.gmra.mxu0 %vm65_vm1, %v314_v58 }
 0x410   :  { %v318_v1 = vpop.permute.xlu2 %317 }
 0x411   :  { %321 = vst.msk [vmem:[#allocation7] sm:$0xf] %vm320_vm14, %v318_v1 }
 0x412   :  { %403 = dma.vmem_to_hbm [thread:$0]  %s399_s19, 64, %s401_s1, [#allocation8]  }
 0x433   :  { %v350_v61 = vpop.f32.mrf.mxu0 }
 0x434   :  { %v373_v62 = vadd.f32 %v372_v7, %v350_v61 }
 0x436   :  { %v379_v63 = vadd.f32 %v477_v2, %v373_v62 }
 0x438   :  { %381 = vst.msk [vmem:[#allocation6] sm:$0xf] %vm380_vm15, %v379_v63 }
 0x439   :  { %392 = dma.vmem_to_hbm [thread:$0]  %s388_s23, 64, %s390_s26, [#allocation5]  }
 0x43a   :  { %582 = dma.done.wait [#allocation5], 64  }
 0x43b   :  { %583 = vsyncadd [#allocation5], 4294967232 }
 0x43c   :  { %584 = dma.done.wait [#allocation8], 64  }
 0x43d   :  { %585 = vsyncadd [#allocation8], 4294967232 }
 0x43e   :  { %412 = vsyncpa [#allocation4], 1 }
 0x43f   :  { %413 = vsyncpa [#allocation5], 1 }
 0x440   :  { %414 = vsyncpa [#allocation8], 1 }

</bundles_post_ra>
